<compile_context>
chip_gen: v7x
topology: tpu7x:2x2x1
jax: 0.10.0
libtpu: 0.0.40
codegen_flags: <defaults>
</compile_context>

<pallas_src>
import jax
import jax.numpy as jnp
from jax.experimental import pallas as pl
from jax.experimental.pallas import tpu as pltpu

FILTER_SIZES = (2, 3, 4)
KMAX = max(FILTER_SIZES)


def textcnn_kernel(emb_ref, w_ref, b_ref, mask_ref, fcw_ref, fcb_ref, out_ref):
    """One batch tile: fused conv matmul + masked max-pool + bias/ReLU + FC."""
    emb = emb_ref[...]                                   # (TB, L+KMAX-1, E) bf16
    L = mask_ref.shape[0]

    # im2col: KMAX shifted views concatenated along the feature axis.
    # Contraction depth becomes KMAX*E (=128 for E=32) -> one lane-full matmul.
    slab = jnp.concatenate([emb[:, k:k + L, :] for k in range(KMAX)], axis=-1)

    # Fused conv for all three filter sizes: (TB, L, KMAX*E) @ (KMAX*E, 3*Fp).
    acc = jnp.einsum('btx,xf->btf', slab, w_ref[...],
                     preferred_element_type=jnp.float32)  # (TB, L, 3*Fp) f32

    # Mask invalid tail positions (windows that ran into the zero padding),
    # then max-pool over time.
    pooled = jnp.max(acc + mask_ref[...][None], axis=1)   # (TB, 3*Fp)

    # Bias + ReLU after the pool (equivalent: bias is t-constant, ReLU monotone).
    h = jnp.maximum(pooled + b_ref[...], 0.0)             # (TB, 3*Fp) f32

    # Dropout(0.1) is identity at inference. FC into a lane-padded Cp output.
    out_ref[...] = jnp.dot(h, fcw_ref[...],
                           preferred_element_type=jnp.float32) + fcb_ref[...]


def _resident(shape):
    """BlockSpec for a weight that stays VMEM-resident across the batch grid."""
    zeros = (0,) * len(shape)
    return pl.BlockSpec(shape, lambda b: zeros)


def textcnn_forward(token_ids, emb_table, conv_ws, conv_bs, fc_w, fc_b,
                    *, batch_tile=None):
    # --- embedding gather: plain-JAX glue ---
    # TODO(synk): fuse the gather into the kernel (scalar-prefetched token ids
    #             driving a manual row-gather DMA) to avoid the HBM round-trip.
    emb = emb_table[token_ids].astype(jnp.bfloat16)       # (B, L, E) bf16
    B, L, E = emb.shape
    F = conv_ws[0].shape[-1]
    C = fc_w.shape[-1]
    nF = len(FILTER_SIZES)
    assert L >= KMAX, "sequence shorter than the largest filter size"

    Fp = ((F + 127) // 128) * 128          # lane-padded filter count
    Cp = ((C + 127) // 128) * 128          # lane-padded class count
    Ftot = nF * Fp
    Lp = L + KMAX - 1

    # Zero-pad the sequence so all filter sizes share one im2col slab.
    emb_pad = jnp.pad(emb, ((0, 0), (0, KMAX - 1), (0, 0)))   # (B, Lp, E)

    # --- fused weight / bias / validity-mask packing ---
    w_all = jnp.zeros((KMAX * E, Ftot), jnp.float32)
    b_all = jnp.zeros((1, Ftot), jnp.float32)
    mask = jnp.zeros((L, Ftot), jnp.float32)
    for i, (K, w, b) in enumerate(zip(FILTER_SIZES, conv_ws, conv_bs)):
        w_all = w_all.at[:K * E, i * Fp:i * Fp + F].set(w.reshape(K * E, F))
        b_all = b_all.at[0, i * Fp:i * Fp + F].set(b.reshape(F))
        t_valid = L - K + 1                                  # valid conv positions
        mask = mask.at[t_valid:, i * Fp:(i + 1) * Fp].set(-1e30)
    w_all = w_all.astype(jnp.bfloat16)

    # FC weight rows rearranged into per-filter-size Fp blocks, cols padded to Cp.
    fcw = jnp.zeros((Ftot, Cp), jnp.float32)
    for i in range(nF):
        fcw = fcw.at[i * Fp:i * Fp + F, :C].set(fc_w[i * F:(i + 1) * F, :])
    fcb = jnp.zeros((1, Cp), jnp.float32).at[0, :C].set(fc_b.reshape(C))

    # --- batch-tiled grid ---
    TB = batch_tile or min(B, 128)
    grid = (pl.cdiv(B, TB),)

    out = pl.pallas_call(
        textcnn_kernel,
        out_shape=jax.ShapeDtypeStruct((B, Cp), jnp.float32),
        grid_spec=pltpu.PrefetchScalarGridSpec(
            num_scalar_prefetch=0,
            grid=grid,
            in_specs=[
                pl.BlockSpec((TB, Lp, E), lambda b: (b, 0, 0)),   # streamed activations
                _resident((KMAX * E, Ftot)),                      # fused conv weights
                _resident((1, Ftot)),                             # fused conv biases
                _resident((L, Ftot)),                             # validity mask
                _resident((Ftot, Cp)),                            # FC weight
                _resident((1, Cp)),                               # FC bias
            ],
            out_specs=pl.BlockSpec((TB, Cp), lambda b: (b, 0)),
        ),
        compiler_params=pltpu.CompilerParams(
            dimension_semantics=("parallel",),
            vmem_limit_bytes=32 * 1024 * 1024,
        ),
    )(emb_pad, w_all, b_all, mask, fcw, fcb)

    return out[:, :C]


def textcnn_reference(token_ids, emb_table, conv_ws, conv_bs, fc_w, fc_b):
    """Pure-JAX f32 reference mirroring the PyTorch forward."""
    emb = emb_table[token_ids].astype(jnp.float32)        # (B, L, E)
    L = emb.shape[1]
    pooled = []
    for K, w, b in zip(FILTER_SIZES, conv_ws, conv_bs):
        T = L - K + 1
        acc = sum(jnp.einsum('bte,ef->btf', emb[:, k:k + T, :], w[k]) for k in range(K))
        acc = jax.nn.relu(acc + b.reshape(1, 1, -1))
        pooled.append(jnp.max(acc, axis=1))
    feats = jnp.concatenate(pooled, axis=1)
    return feats @ fc_w + fc_b


if __name__ == "__main__":
    # Small deterministic setup consistent with the module:
    vocab_size, embed_size = 100, 32
    num_filters, num_classes = 32, 2
    batch, seq_len = 2, 8

    key = jax.random.PRNGKey(0)
    k_emb, k_tok, k_fw, k_fb, *k_convs = jax.random.split(key, 4 + 2 * len(FILTER_SIZES))

    emb_table = jax.random.normal(k_emb, (vocab_size, embed_size), jnp.float32) * 0.1
    token_ids = jax.random.randint(k_tok, (batch, seq_len), 0, vocab_size, jnp.int32)

    conv_ws, conv_bs = [], []
    for i, K in enumerate(FILTER_SIZES):
        kw, kb = k_convs[2 * i], k_convs[2 * i + 1]
        conv_ws.append(jax.random.normal(kw, (K, embed_size, num_filters), jnp.float32) * 0.1)
        conv_bs.append(jax.random.normal(kb, (1, num_filters), jnp.float32) * 0.1)

    fc_w = jax.random.normal(k_fw, (len(FILTER_SIZES) * num_filters, num_classes),
                             jnp.float32) * 0.1
    fc_b = jax.random.normal(k_fb, (1, num_classes), jnp.float32) * 0.1

    out = textcnn_forward(token_ids, emb_table, conv_ws, conv_bs, fc_w, fc_b)
    out = jax.block_until_ready(out)

    ref = textcnn_reference(token_ids, emb_table, conv_ws, conv_bs, fc_w, fc_b)
    assert out.shape == (batch, num_classes)
    # bf16 inputs / f32 accumulation in the kernel vs. a pure-f32 reference:
    # tolerance loosened accordingly.
    assert jnp.allclose(out, ref, atol=2e-2, rtol=2e-2), (out, ref)

    print("KERNEL_OK")
</pallas_src>

<mosaic_0001>
module attributes {stable_mosaic.version = 11 : i64} {
  func.func @textcnn_kernel(%arg0: i32, %arg1: memref<2x11x32xbf16, #tpu.memory_space<vmem>>, %arg2: memref<128x384xbf16, #tpu.memory_space<vmem>>, %arg3: memref<1x384xf32, #tpu.memory_space<vmem>>, %arg4: memref<8x384xf32, #tpu.memory_space<vmem>>, %arg5: memref<384x128xf32, #tpu.memory_space<vmem>>, %arg6: memref<1x128xf32, #tpu.memory_space<vmem>>, %arg7: memref<2x128xf32, #tpu.memory_space<vmem>>) attributes {dimension_semantics = [#tpu.dimension_semantics<parallel>], iteration_bounds = array<i64: 1>, scalar_prefetch = 0 : i64, scratch_operands = 0 : i64, tpu.core_type = #tpu.core_type<tc>, window_params = [{transform_indices = @transform_0, window_bounds = array<i64: 2, 11, 32>}, {pipeline_mode = #tpu.pipeline_mode<synchronous>, transform_indices = @transform_1, window_bounds = array<i64: 128, 384>}, {pipeline_mode = #tpu.pipeline_mode<synchronous>, transform_indices = @transform_2, window_bounds = array<i64: 1, 384>}, {pipeline_mode = #tpu.pipeline_mode<synchronous>, transform_indices = @transform_3, window_bounds = array<i64: 8, 384>}, {pipeline_mode = #tpu.pipeline_mode<synchronous>, transform_indices = @transform_4, window_bounds = array<i64: 384, 128>}, {pipeline_mode = #tpu.pipeline_mode<synchronous>, transform_indices = @transform_5, window_bounds = array<i64: 1, 128>}, {transform_indices = @transform_6, window_bounds = array<i64: 2, 128>}]} {
    %c0 = arith.constant 0 : index
    %c0_0 = arith.constant 0 : index
    %c0_1 = arith.constant 0 : index
    %0 = vector.load %arg1[%c0, %c0_0, %c0_1] : memref<2x11x32xbf16, #tpu.memory_space<vmem>>, vector<2x11x32xbf16>
    %1 = vector.extract_strided_slice %0 {offsets = [0, 0, 0], sizes = [2, 8, 32], strides = [1, 1, 1]} : vector<2x11x32xbf16> to vector<2x8x32xbf16>
    %2 = vector.extract_strided_slice %0 {offsets = [0, 1, 0], sizes = [2, 8, 32], strides = [1, 1, 1]} : vector<2x11x32xbf16> to vector<2x8x32xbf16>
    %3 = vector.extract_strided_slice %0 {offsets = [0, 2, 0], sizes = [2, 8, 32], strides = [1, 1, 1]} : vector<2x11x32xbf16> to vector<2x8x32xbf16>
    %4 = vector.extract_strided_slice %0 {offsets = [0, 3, 0], sizes = [2, 8, 32], strides = [1, 1, 1]} : vector<2x11x32xbf16> to vector<2x8x32xbf16>
    %5 = tpu.concatenate %1, %2, %3, %4 in 2 : vector<2x8x32xbf16>, vector<2x8x32xbf16>, vector<2x8x32xbf16>, vector<2x8x32xbf16> -> vector<2x8x128xbf16>
    %c0_2 = arith.constant 0 : index
    %c0_3 = arith.constant 0 : index
    %6 = vector.load %arg2[%c0_2, %c0_3] : memref<128x384xbf16, #tpu.memory_space<vmem>>, vector<128x384xbf16>
    "tpu.trace_start"() <{level = 10 : i32, message = "btx,xf->btf"}> : () -> ()
    %cst = arith.constant dense<0.000000e+00> : vector<2x8x384xf32>
    %7 = tpu.matmul %5, %6, %cst {dimension_numbers = #tpu.dot_dimension_numbers<[2], [0], [0, 1], [1], [0, 0, 0, 1, 1, 1], [], []>} : vector<2x8x128xbf16>, vector<128x384xbf16>, vector<2x8x384xf32> -> vector<2x8x384xf32>
    "tpu.trace_stop"() : () -> ()
    %c0_4 = arith.constant 0 : index
    %c0_5 = arith.constant 0 : index
    %8 = vector.load %arg4[%c0_4, %c0_5] : memref<8x384xf32, #tpu.memory_space<vmem>>, vector<8x384xf32>
    %9 = vector.shape_cast %8 : vector<8x384xf32> to vector<1x8x384xf32>
    %10 = vector.broadcast %9 : vector<1x8x384xf32> to vector<2x8x384xf32>
    %11 = arith.addf %7, %10 : vector<2x8x384xf32>
    %cst_6 = arith.constant dense<0xFF800000> : vector<2x384xf32>
    %12 = vector.multi_reduction <maximumf>, %11, %cst_6 [1] : vector<2x8x384xf32> to vector<2x384xf32>
    %c0_7 = arith.constant 0 : index
    %c0_8 = arith.constant 0 : index
    %13 = vector.load %arg3[%c0_7, %c0_8] : memref<1x384xf32, #tpu.memory_space<vmem>>, vector<1x384xf32>
    %14 = vector.broadcast %13 : vector<1x384xf32> to vector<2x384xf32>
    %15 = arith.addf %12, %14 : vector<2x384xf32>
    %cst_9 = arith.constant 0.000000e+00 : f32
    %16 = vector.broadcast %cst_9 : f32 to vector<2x384xf32>
    %17 = arith.maximumf %15, %16 : vector<2x384xf32>
    %c0_10 = arith.constant 0 : index
    %c0_11 = arith.constant 0 : index
    %18 = vector.load %arg5[%c0_10, %c0_11] : memref<384x128xf32, #tpu.memory_space<vmem>>, vector<384x128xf32>
    %cst_12 = arith.constant dense<0.000000e+00> : vector<2x128xf32>
    %19 = tpu.matmul %17, %18, %cst_12 {dimension_numbers = #tpu.dot_dimension_numbers<[1], [0], [0], [1], [0, 0, 1, 1], [], []>} : vector<2x384xf32>, vector<384x128xf32>, vector<2x128xf32> -> vector<2x128xf32>
    %c0_13 = arith.constant 0 : index
    %c0_14 = arith.constant 0 : index
    %20 = vector.load %arg6[%c0_13, %c0_14] : memref<1x128xf32, #tpu.memory_space<vmem>>, vector<1x128xf32>
    %21 = vector.broadcast %20 : vector<1x128xf32> to vector<2x128xf32>
    %22 = arith.addf %19, %21 : vector<2x128xf32>
    %c0_15 = arith.constant 0 : index
    %c0_16 = arith.constant 0 : index
    %23 = vector.load %arg7[%c0_15, %c0_16] : memref<2x128xf32, #tpu.memory_space<vmem>>, vector<2x128xf32>
    tpu.vector_store %arg7[%c0_15, %c0_16], %22 {strides = array<i32>} : memref<2x128xf32, #tpu.memory_space<vmem>>, vector<2x128xf32>,
    return
  }
  func.func @transform_0(%arg0: i32) -> (i32, i32, i32) {
    %c0_i32 = arith.constant 0 : i32
    %c0_i32_0 = arith.constant 0 : i32
    %c0_i32_1 = arith.constant 0 : i32
    return %arg0, %c0_i32, %c0_i32_0 : i32, i32, i32
  }
  func.func @transform_1(%arg0: i32) -> (i32, i32) {
    %c0_i32 = arith.constant 0 : i32
    %c0_i32_0 = arith.constant 0 : i32
    %c0_i32_1 = arith.constant 0 : i32
    return %c0_i32, %c0_i32_0 : i32, i32
  }
  func.func @transform_2(%arg0: i32) -> (i32, i32) {
    %c0_i32 = arith.constant 0 : i32
    %c0_i32_0 = arith.constant 0 : i32
    %c0_i32_1 = arith.constant 0 : i32
    return %c0_i32, %c0_i32_0 : i32, i32
  }
  func.func @transform_3(%arg0: i32) -> (i32, i32) {
    %c0_i32 = arith.constant 0 : i32
    %c0_i32_0 = arith.constant 0 : i32
    %c0_i32_1 = arith.constant 0 : i32
    return %c0_i32, %c0_i32_0 : i32, i32
  }
  func.func @transform_4(%arg0: i32) -> (i32, i32) {
    %c0_i32 = arith.constant 0 : i32
    %c0_i32_0 = arith.constant 0 : i32
    %c0_i32_1 = arith.constant 0 : i32
    return %c0_i32, %c0_i32_0 : i32, i32
  }
  func.func @transform_5(%arg0: i32) -> (i32, i32) {
    %c0_i32 = arith.constant 0 : i32
    %c0_i32_0 = arith.constant 0 : i32
    %c0_i32_1 = arith.constant 0 : i32
    return %c0_i32, %c0_i32_0 : i32, i32
  }
  func.func @transform_6(%arg0: i32) -> (i32, i32) {
    %c0_i32 = arith.constant 0 : i32
    %c0_i32_0 = arith.constant 0 : i32
    return %arg0, %c0_i32 : i32, i32
  }
}

</mosaic_0001>

<bundles_post_ra>
// kernel: tpu_custom_call.1
= control target key start
LH: loop header
LB: loop body
LE: loop exit
PB: predicated region body
PF: predicated region fallthrough
CT: control target
= control target key end

     0   :  { %11 = vsyncpa [#allocation3], 0  ;;  %s1124_s0 = inlined_call_operand.vmem [shape: bf16[2,11,32], index: 0, kind: input, shape index: {}]   ;;  %s1125_s1 = inlined_call_operand.hbm [shape: bf16[128,384], index: 1, kind: input, shape index: {}]   ;;  %s1126_s2 = inlined_call_operand.vmem [shape: f32[1,384], index: 2, kind: input, shape index: {}]   ;;  %s1127_s3 = inlined_call_operand.vmem [shape: f32[8,384], index: 3, kind: input, shape index: {}]   ;;  %s1128_s4 = inlined_call_operand.hbm [shape: f32[384,128], index: 4, kind: input, shape index: {}]   ;;  %s1129_s5 = inlined_call_operand.vmem [shape: f32[1,128], index: 5, kind: input, shape index: {}]   ;;  %s1130_s6 = inlined_call_operand.hbm [shape: f32[2,128], index: 6, kind: output, shape index: {}]  }
   0x1   :  { %12 = vsyncpa [#allocation6], 0 }
   0x2   :  { %13 = vsyncpa [#allocation4], 0  ;;  %s984_s21 = smov [#allocation2]   ;;  %s912_s25 = scalar_lea.hbm %s1125_s1, 3072 }
   0x3   :  { %s21_s22 = sshll.u32 %s984_s21, 4  ;;  %p913_p0 = scmp.ne.s32.totalorder %s1125_s1, %s912_s25  ;;  %s22_s22 = int_to_ptr.vmem [resolvable:$true] %s21_s22 }
   0x4   :  { %p916_p1 = scmp.lt.u32.totalorder %s912_s25, %s1125_s1 }
   0x6   :  { %p918_p2 = pnand %p916_p1, %p913_p0 }
   0x8   :  { %921 = shalt.err (!%p918_p2)
}
   0x9   :  { %s922_s30 = scalar_lea.vmem %s22_s22, 3072  ;;  %p927_p4 = scmp.lt.s32.totalorder %s22_s22, %s22_s22 }
   0xa   :  { %p923_p3 = scmp.ne.s32.totalorder %s22_s22, %s922_s30  ;;  %p928_p5 = scmp.lt.s32.totalorder %s922_s30, %s922_s30 }
   0xc   :  { %p929_p6 = por %p928_p5, %p927_p4 }
   0xe   :  { %p930_p7 = pnand %p929_p6, %p923_p3 }
  0x10   :  { %933 = shalt.err (!%p930_p7)
}
  0x11   :  { %s985_s7 = smov 192   ;;  %s986_s8 = smov 12  }
  0x12   :  { %27 = dma.hbm_to_vmem [thread:$0]  %s1125_s1, 3072, %s22_s22, [#allocation3], %s985_s7, %s985_s7, %s986_s8  }
  0x13   :  { %s987_s11 = smov [#allocation5]   ;;  %s934_s15 = scalar_lea.hbm %s1128_s4, 6144 }
  0x14   :  { %s37_s12 = sshll.u32 %s987_s11, 4  ;;  %p935_p8 = scmp.ne.s32.totalorder %s1128_s4, %s934_s15  ;;  %s38_s12 = int_to_ptr.vmem [resolvable:$true] %s37_s12 }
  0x15   :  { %p938_p9 = scmp.lt.u32.totalorder %s934_s15, %s1128_s4 }
  0x17   :  { %p940_p10 = pnand %p938_p9, %p935_p8 }
  0x19   :  { %943 = shalt.err (!%p940_p10)
}
  0x1a   :  { %s944_s20 = scalar_lea.vmem %s38_s12, 6144  ;;  %p949_p12 = scmp.lt.s32.totalorder %s38_s12, %s38_s12 }
  0x1b   :  { %p945_p11 = scmp.ne.s32.totalorder %s38_s12, %s944_s20  ;;  %p950_p13 = scmp.lt.s32.totalorder %s944_s20, %s944_s20 }
  0x1d   :  { %p951_p0 = por %p950_p13, %p949_p12 }
  0x1f   :  { %p952_p1 = pnand %p951_p0, %p945_p11 }
  0x21   :  { %955 = shalt.err (!%p952_p1)
}
  0x22   :  { %s988_s1 = smov 128   ;;  %s989_s21 = smov 8  }
  0x23   :  { %43 = dma.hbm_to_vmem [thread:$0]  %s1128_s4, 6144, %s38_s12, [#allocation6], %s988_s1, %s988_s1, %s989_s21  }
  0x24   :  { %978 = dma.done.wait [#allocation3], 3072  }
  0x25   :  { %979 = vsyncadd [#allocation3], 4294964224 }
  0x26   :  { %980 = dma.done.wait [#allocation6], 6144  }
  0x27   :  { %981 = vsyncadd [#allocation6], 4294961152  ;;  %v990_v0 = vmov 0.0   ;;  %v1061_v1 = vld [vmem:[%s1124_s0] sm:$0xf]  ;;  %s991_s7 = smov 64  }
  0x28   :  { %753 = vmatprep.subr.bf16.mxu1 %v990_v0  ;;  %v54_v2 = vld [vmem:[%s1124_s0 + $0x4] sm:$0x3]  ;;  %v1069_v3 = vld [vmem:[%s1124_s0 + $0x8] sm:$0xf]  ;;  %v56_v5 = vld [vmem:[%s1124_s0 + $0xc] sm:$0x3] }
  0x29   :  { %v664_v4 = vcombine.low %v1061_v1, %v54_v2  ;;  %v665_v6 = vcombine.low %v1069_v3, %v56_v5  ;;  %v880_v7 = vld [vmem:[#allocation2 + $0x4] ss:$12 sps:$4 sm:$0xff]   ;;  %v882_v8 = vld [vmem:[#allocation2] ss:$12 sps:$4 sm:$0xff]   ;;  %v883_v14 = vld [vmem:[#allocation2 + $0x8] ss:$12 sps:$4 sm:$0xff]  }
  0x2a   :  { %287 = vmatprep.subr.bf16.mxu0 %v880_v7  ;;  %v884_v17 = vld [vmem:[#allocation2 + $0x1c] ss:$12 sps:$4 sm:$0xff]   ;;  %754 = vmatpush3.bf16.msra.mxu1 %v883_v14  ;;  %v886_v21 = vld [vmem:[#allocation2 + $0x18] ss:$12 sps:$4 sm:$0xff]   ;;  %v887_v23 = vld [vmem:[#allocation2 + $0x20] ss:$12 sps:$4 sm:$0xff]  }
  0x2b   :  { %v85_v9 = vrot.slane %v664_v4, 1  ;;  %v68_v10 = vshrl.u32 %v664_v4, 16  ;;  %v70_v11 = vshll.u32 %v664_v4, 16  ;;  %v75_v12 = vshrl.u32 %v665_v6, 16  ;;  %288 = vmatpush1.bf16.msra.mxu0 %v882_v8  ;;  %755 = vmatprep.subr.bf16.mxu1 %v990_v0  ;;  %v888_v25 = vld [vmem:[#allocation2 + $0x34] ss:$12 sps:$4 sm:$0xff]  }
  0x2c   :  { %v77_v13 = vshll.u32 %v665_v6, 16  ;;  %v86_v16 = vrot.slane %v665_v6, 1  ;;  %289 = vmatprep.subr.bf16.mxu0 %v884_v17  ;;  %s992_s0 = smov 32   ;;  %v890_v29 = vld [vmem:[#allocation2 + $0x30] ss:$12 sps:$4 sm:$0xff]   ;;  %v993_v32 = vmov 0  }
  0x2d   :  { %87 = vrot.lane.b32.xlu1 %v85_v9, %s991_s7  ;;  %v72_v15 = vrot.slane %v70_v11, 1  ;;  %v94_v19 = vrot.slane %v75_v12, 1  ;;  %v91_v24 = vrot.slane %v68_v10, 1  ;;  %v92_v28 = vrot.slane %v70_v11, 2  ;;  %v891_v30 = vld [vmem:[#allocation2 + $0x38] ss:$12 sps:$4 sm:$0xff]   ;;  %319 = vmatprep.mubr.bf16.mxu0 %v993_v32 }
  0x2e   :  { %v79_v18 = vrot.slane %v77_v13, 1  ;;  %v95_v20 = vrot.slane %v77_v13, 2  ;;  %756 = vmatpush3.bf16.msra.mxu1 %v887_v23  ;;  %v892_v31 = vld [vmem:[#allocation2 + $0x4c] ss:$12 sps:$4 sm:$0xff]   ;;  %vm994_vm0 = vmmov 0   ;;  %s995_s8 = smov 96  }
  0x2f   :  { %v73_v22 = vor.u32 %v72_v15, %v68_v10  ;;  %290 = vmatpush1.bf16.msra.mxu0 %v886_v21  ;;  %757 = vmatprep.subr.bf16.mxu1 %v990_v0  ;;  %v93_v33 = vor.u32 %v92_v28, %v91_v24  ;;  %v894_v34 = vld [vmem:[#allocation2 + $0x48] ss:$12 sps:$4 sm:$0xff]   ;;  %v895_v35 = vld [vmem:[#allocation2 + $0x50] ss:$12 sps:$4 sm:$0xff]   ;;  %v898_v37 = vld [vmem:[#allocation2 + $0x60] ss:$12 sps:$4 sm:$0xff]  }
  0x30   :  { %v80_v26 = vor.u32 %v79_v18, %v75_v12  ;;  %v96_v27 = vor.u32 %v95_v20, %v94_v19  ;;  %291 = vmatprep.subr.bf16.mxu0 %v888_v25  ;;  %769 = vmatprep.mubr.msk.bf16.mxu1 %vm994_vm0, %v990_v0  ;;  %v896_v36 = vld [vmem:[#allocation2 + $0x64] ss:$12 sps:$4 sm:$0xff]   ;;  %v899_v38 = vld [vmem:[#allocation2 + $0x68] ss:$12 sps:$4 sm:$0xff]   ;;  %v903_v41 = vld [vmem:[#allocation2 + $0x80] ss:$12 sps:$4 sm:$0xff]  }
  0x31   :  { %81 = vrot.lane.b32.xlu0 %v73_v22, %s992_s0  ;;  %89 = vrot.lane.b32.xlu1 %v86_v16, %s991_s7  ;;  %v900_v39 = vld [vmem:[#allocation2 + $0x7c] ss:$12 sps:$4 sm:$0xff]   ;;  %v902_v40 = vld [vmem:[#allocation2 + $0x78] ss:$12 sps:$4 sm:$0xff]   ;;  %v904_v42 = vld [vmem:[#allocation2 + $0x94] ss:$12 sps:$4 sm:$0xff]  }
  0x32   :  { %758 = vmatpush3.bf16.msra.mxu1 %v891_v30  ;;  %v906_v43 = vld [vmem:[#allocation2 + $0x90] ss:$12 sps:$4 sm:$0xff]   ;;  %v907_v44 = vld [vmem:[#allocation2 + $0x98] ss:$12 sps:$4 sm:$0xff]   ;;  %v453_v47 = vld [vmem:[#allocation5 + $0x88] sm:$0xff]  ;;  %v996_v51 = vmov 0.0|0.0  }
  0x33   :  { %292 = vmatpush1.bf16.msra.mxu0 %v890_v29  ;;  %759 = vmatprep.subr.bf16.mxu1 %v990_v0  ;;  %v908_v45 = vld [vmem:[#allocation2 + $0xac] ss:$12 sps:$4 sm:$0xff]   ;;  %v452_v46 = vld [vmem:[#allocation5 + $0x80] sm:$0xff]  ;;  %v910_v48 = vld [vmem:[#allocation2 + $0xa8] ss:$12 sps:$4 sm:$0xff]   ;;  %vm101_vm1 = vcmask 261120  }
  0x34   :  { %293 = vmatprep.subr.bf16.mxu0 %v892_v31  ;;  %v911_v49 = vld [vmem:[#allocation2 + $0xb0] ss:$12 sps:$4 sm:$0xff]   ;;  %v808_v50 = vpack.c.bf16 %v453_v47, %v452_v46  ;;  %vm108_vm2 = vcmask 523264   ;;  %v468_v58 = vld [vmem:[#allocation5 + $0x100] sm:$0xff]  ;;  %vm113_vm3 = vcmask 785408   ;;  %v469_v61 = vld [vmem:[#allocation5 + $0x108] sm:$0xff] }
  0x35   :  { %83 = vrot.lane.b32.xlu0 %v80_v26, %s992_s0  ;;  %99 = vrot.lane.b32.xlu1 %v96_v27, %s995_s8  ;;  %v436_v62 = vld [vmem:[#allocation5] sm:$0xff]  ;;  %v437_v63 = vld [vmem:[#allocation5 + $0x8] sm:$0xff]  ;;  %v454_v2 = vld [vmem:[#allocation5 + $0x90] sm:$0xff]  ;;  %v841_v9 = vpack.c.bf16 %v469_v61, %v468_v58  ;;  %vm498_vm4 = vcmask 1041409   ;;  %s997_s17 = smov [#allocation7]  }
  0x36   :  { %760 = vmatpush3.bf16.msra.mxu1 %v895_v35  ;;  %v455_v4 = vld [vmem:[#allocation5 + $0x98] sm:$0xff]  ;;  %v810_v10 = vpack.c.bf16 %v437_v63, %v436_v62  ;;  %v470_v11 = vld [vmem:[#allocation5 + $0x110] sm:$0xff]  ;;  %v472_v17 = vld [vmem:[#allocation5 + $0x120] sm:$0xff]  ;;  %s654_s18 = sshll.u32 %s997_s17, 4  ;;  %s655_s18 = int_to_ptr.vmem [resolvable:$true] %s654_s18 }
  0x37   :  { %294 = vmatpush1.bf16.msra.mxu0 %v894_v34  ;;  %761 = vmatprep.subr.bf16.mxu1 %v990_v0  ;;  %v471_v12 = vld [vmem:[#allocation5 + $0x118] sm:$0xff]  ;;  %v438_v13 = vld [vmem:[#allocation5 + $0x10] sm:$0xff]  ;;  %v473_v18 = vld [vmem:[#allocation5 + $0x128] sm:$0xff]  ;;  %s956_s19 = scalar_lea.vmem %s655_s18, 32  ;;  %p961_p3 = scmp.lt.s32.totalorder %s655_s18, %s655_s18 }
  0x38   :  { %295 = vmatprep.subr.bf16.mxu0 %v896_v36  ;;  %v439_v14 = vld [vmem:[#allocation5 + $0x18] sm:$0xff]  ;;  %v844_v15 = vpack.c.bf16 %v471_v12, %v470_v11  ;;  %v847_v19 = vpack.c.bf16 %v473_v18, %v472_v17  ;;  %v456_v20 = vld [vmem:[#allocation5 + $0xa0] sm:$0xff]  ;;  %v457_v21 = vld [vmem:[#allocation5 + $0xa8] sm:$0xff]  ;;  %p957_p2 = scmp.ne.s32.totalorder %s655_s18, %s956_s19  ;;  %p962_p4 = scmp.lt.s32.totalorder %s956_s19, %s956_s19 }
  0x39   :  { %97 = vrot.lane.b32.xlu0 %v93_v33, %s995_s8  ;;  %v814_v16 = vpack.c.bf16 %v439_v14, %v438_v13  ;;  %v816_v22 = vpack.c.bf16 %v457_v21, %v456_v20  ;;  %v440_v23 = vld [vmem:[#allocation5 + $0x20] sm:$0xff]  ;;  %v441_v24 = vld [vmem:[#allocation5 + $0x28] sm:$0xff]  ;;  %v474_v26 = vld [vmem:[#allocation5 + $0x130] sm:$0xff] }
  0x3a   :  { %762 = vmatpush3.bf16.msra.mxu1 %v899_v38  ;;  %v818_v25 = vpack.c.bf16 %v441_v24, %v440_v23  ;;  %v475_v27 = vld [vmem:[#allocation5 + $0x138] sm:$0xff]  ;;  %v458_v28 = vld [vmem:[#allocation5 + $0xb0] sm:$0xff]  ;;  %v476_v34 = vld [vmem:[#allocation5 + $0x140] sm:$0xff]  ;;  %p963_p5 = por %p962_p4, %p961_p3 }
  0x3b   :  { %296 = vmatpush1.bf16.msra.mxu0 %v898_v37  ;;  %763 = vmatprep.subr.bf16.mxu1 %v990_v0  ;;  %v459_v29 = vld [vmem:[#allocation5 + $0xb8] sm:$0xff]  ;;  %v442_v31 = vld [vmem:[#allocation5 + $0x30] sm:$0xff]  ;;  %v477_v35 = vld [vmem:[#allocation5 + $0x148] sm:$0xff] }
  0x3c   :  { %297 = vmatprep.subr.bf16.mxu0 %v900_v39  ;;  %v820_v30 = vpack.c.bf16 %v459_v29, %v458_v28  ;;  %v443_v32 = vld [vmem:[#allocation5 + $0x38] sm:$0xff]  ;;  %v853_v36 = vpack.c.bf16 %v477_v35, %v476_v34  ;;  %v460_v37 = vld [vmem:[#allocation5 + $0xc0] sm:$0xff]  ;;  %v461_v38 = vld [vmem:[#allocation5 + $0xc8] sm:$0xff]  ;;  %p964_p6 = pnand %p963_p5, %p957_p2 }
  0x3d   :  { %v822_v33 = vpack.c.bf16 %v443_v32, %v442_v31  ;;  %v824_v39 = vpack.c.bf16 %v461_v38, %v460_v37  ;;  %v462_v46 = vld [vmem:[#allocation5 + $0xd0] sm:$0xff]  ;;  %v463_v47 = vld [vmem:[#allocation5 + $0xd8] sm:$0xff] }
  0x3e   :  { %764 = vmatpush3.bf16.msra.mxu1 %v903_v41  ;;  %v445_v41 = vld [vmem:[#allocation5 + $0x48] sm:$0xff]  ;;  %v482_v62 = vld [vmem:[#allocation5 + $0x170] sm:$0xff]  ;;  %v483_v63 = vld [vmem:[#allocation5 + $0x178] sm:$0xff] }
  0x3f   :  { %298 = vmatpush1.bf16.msra.mxu0 %v902_v40  ;;  %765 = vmatprep.subr.bf16.mxu1 %v990_v0  ;;  %v444_v40 = vld [vmem:[#allocation5 + $0x40] sm:$0xff]  ;;  %v152_v11 = vld [vmem:[%s1127_s3 + $0x10] sm:$0xff] }
  0x40   :  { %299 = vmatprep.subr.bf16.mxu0 %v904_v42  ;;  %v826_v42 = vpack.c.bf16 %v445_v41, %v444_v40 }
  0x42   :  { %766 = vmatpush3.bf16.msra.mxu1 %v907_v44  ;;  %v479_v44 = vld [vmem:[#allocation5 + $0x158] sm:$0xff] }
  0x43   :  { %300 = vmatpush1.bf16.msra.mxu0 %v906_v43  ;;  %767 = vmatprep.subr.bf16.mxu1 %v990_v0  ;;  %v478_v43 = vld [vmem:[#allocation5 + $0x150] sm:$0xff] }
  0x44   :  { %301 = vmatprep.subr.bf16.mxu0 %v908_v45  ;;  %v856_v45 = vpack.c.bf16 %v479_v44, %v478_v43 }
  0x46   :  { %768 = vmatpush3.bf16.msra.mxu1 %v911_v49  ;;  %v446_v49 = vld [vmem:[#allocation5 + $0x50] sm:$0xff] }
  0x47   :  { %302 = vmatpush1.bf16.msra.mxu0 %v910_v48  ;;  %840 = vmatprep.subr.bf16.mxu1 %v996_v51  ;;  %v828_v48 = vpack.c.bf16 %v463_v47, %v462_v46 }
  0x48   :  { %809 = vmatprep.subr.bf16.mxu0 %v808_v50  ;;  %v447_v50 = vld [vmem:[#allocation5 + $0x58] sm:$0xff] }
  0x9f   :  { %v88_v52 = vpop.permute.xlu1 %87 }
  0xa3   :  { %v82_v53 = vpop.permute.xlu0 %81  ;;  %v90_v54 = vpop.permute.xlu1 %89 }
  0xa4   :  { %v104_v56 = vsel %vm101_vm1, %v1061_v1, %v82_v53  ;;  %v480_v53 = vld [vmem:[#allocation5 + $0x160] sm:$0xff] }
  0xa5   :  { %v110_v5 = vsel %vm108_vm2, %v104_v56, %v88_v52  ;;  %v830_v52 = vpack.c.bf16 %v447_v50, %v446_v49  ;;  %v464_v56 = vld [vmem:[#allocation5 + $0xe0] sm:$0xff] }
  0xa7   :  { %v84_v55 = vpop.permute.xlu0 %83  ;;  %v100_v59 = vpop.permute.xlu1 %99 }
  0xa8   :  { %v107_v57 = vsel %vm101_vm1, %v1069_v3, %v84_v55  ;;  %v812_v3 = vpack.c.bf16 %v455_v4, %v454_v2  ;;  %v466_v2 = vld [vmem:[#allocation5 + $0xf0] sm:$0xff]  ;;  %v862_v4 = vpack.c.bf16 %v483_v63, %v482_v62 }
  0xa9   :  { %v112_v60 = vsel %vm108_vm2, %v107_v57, %v90_v54  ;;  %v481_v54 = vld [vmem:[#allocation5 + $0x168] sm:$0xff] }
  0xaa   :  { %v117_v7 = vsel %vm113_vm3, %v112_v60, %v100_v59  ;;  %v859_v55 = vpack.c.bf16 %v481_v54, %v480_v53  ;;  %v465_v57 = vld [vmem:[#allocation5 + $0xe8] sm:$0xff]  ;;  %v448_v59 = vld [vmem:[#allocation5 + $0x60] sm:$0xff] }
  0xab   :  { %v98_v6 = vpop.permute.xlu0 %97  ;;  %v832_v58 = vpack.c.bf16 %v465_v57, %v464_v56  ;;  %v449_v60 = vld [vmem:[#allocation5 + $0x68] sm:$0xff] }
  0xac   :  { %v115_v8 = vsel %vm113_vm3, %v110_v5, %v98_v6  ;;  %v834_v61 = vpack.c.bf16 %v449_v60, %v448_v59  ;;  %v467_v5 = vld [vmem:[#allocation5 + $0xf8] sm:$0xff]  ;;  %v450_v6 = vld [vmem:[#allocation5 + $0x70] sm:$0xff] }
  0xad   :  { %v666_v1 = vcombine.low %v115_v8, %v117_v7  ;;  %v451_v7 = vld [vmem:[#allocation5 + $0x78] sm:$0xff]  ;;  %v836_v8 = vpack.c.bf16 %v467_v5, %v466_v2 }
  0xaf   :  { %320 = vmatmul.mubr.bf16.vlgmr.msra.gmra.mrb[0].mxu0 %v666_v1  ;;  %770 = vmatmul.mubr.bf16.vlgmr.msra.gmra.mrb[0].mxu1 %v666_v1 }
  0xb0   :  { %842 = vmatpush3.bf16.msra.mxu1 %v841_v9  ;;  %811 = vmatpush3.bf16.msra.mxu0 %v810_v10  ;;  %v838_v9 = vpack.c.bf16 %v451_v7, %v450_v6  ;;  %v150_v10 = vld [vmem:[%s1127_s3] sm:$0xff] }
  0xb1   :  { %843 = vmatprep.subr.bf16.mxu1 %v996_v51  ;;  %813 = vmatprep.subr.bf16.mxu0 %v812_v3  ;;  %v409_v3 = vlaneseq }
  0xb2   :  { %805 = vmatprep.mubr.msk.f32.mxu1 %vm994_vm0, %v990_v0  ;;  %v850_v0 = vpack.c.bf16 %v475_v27, %v474_v26 }
  0xb3   :  { %v410_v27 = vshrl.u32 %v409_v3, 7 }
  0xb4   :  { %845 = vmatpush3.bf16.msra.mxu1 %v844_v15  ;;  %815 = vmatpush3.bf16.msra.mxu0 %v814_v16 }
  0xb5   :  { %846 = vmatprep.subr.bf16.mxu1 %v996_v51  ;;  %817 = vmatprep.subr.bf16.mxu0 %v816_v22  ;;  %v419_v40 = vsub.s32 2, %v410_v27  ;;  %v415_v49 = vsub.s32 1, %v410_v27 }
  0xb8   :  { %848 = vmatpush3.bf16.msra.mxu1 %v847_v19  ;;  %819 = vmatpush3.bf16.msra.mxu0 %v818_v25 }
  0xb9   :  { %849 = vmatprep.subr.bf16.mxu1 %v996_v51  ;;  %821 = vmatprep.subr.bf16.mxu0 %v820_v30 }
  0xbc   :  { %851 = vmatpush3.bf16.msra.mxu1 %v850_v0  ;;  %823 = vmatpush3.bf16.msra.mxu0 %v822_v33 }
  0xbd   :  { %852 = vmatprep.subr.bf16.mxu1 %v996_v51  ;;  %825 = vmatprep.subr.bf16.mxu0 %v824_v39  ;;  %v411_v39 = vsub.s32 0, %v410_v27 }
  0xc0   :  { %854 = vmatpush3.bf16.msra.mxu1 %v853_v36  ;;  %827 = vmatpush3.bf16.msra.mxu0 %v826_v42 }
  0xc1   :  { %855 = vmatprep.subr.bf16.mxu1 %v996_v51  ;;  %829 = vmatprep.subr.bf16.mxu0 %v828_v48 }
  0xc4   :  { %857 = vmatpush3.bf16.msra.mxu1 %v856_v45  ;;  %831 = vmatpush3.bf16.msra.mxu0 %v830_v52  ;;  %v407_v45 = vld [vmem:[%s1126_s2] sm:$0x7] }
  0xc5   :  { %858 = vmatprep.subr.bf16.mxu1 %v996_v51  ;;  %833 = vmatprep.subr.bf16.mxu0 %v832_v58  ;;  %v412_v56 = vrot.slane %v407_v45, %v411_v39  ;;  %v420_v57 = vrot.slane %v407_v45, %v419_v40 }
  0xc8   :  { %860 = vmatpush3.bf16.msra.mxu1 %v859_v55  ;;  %835 = vmatpush3.bf16.msra.mxu0 %v834_v61 }
  0xc9   :  { %861 = vmatprep.subr.bf16.mxu1 %v996_v51  ;;  %837 = vmatprep.subr.bf16.mxu0 %v836_v8  ;;  %v151_v51 = vld [vmem:[%s1127_s3 + $0x8] sm:$0xff] }
  0xcc   :  { %863 = vmatpush3.bf16.msra.mxu1 %v862_v4  ;;  %839 = vmatpush3.bf16.msra.mxu0 %v838_v9  ;;  %v416_v4 = vrot.slane %v407_v45, %v415_v49 }
 0x182   :  { %v321_v1 = vpop.f32.mrb[0].mxu0  ;;  %v364_v12 = vpop.f32.mrb[0].mxu1 }
 0x183   :  { %v322_v13 = vadd.f32 %v321_v1, %v150_v10  ;;  %v365_v14 = vadd.f32 %v364_v12, %v152_v11  ;;  %v323_v15 = vpop.f32.mrb[1].mxu0  ;;  %v771_v16 = vpop.f32.mrb[1].mxu1 }
 0x184   :  { %v324_v17 = vadd.f32 %v323_v15, %v151_v51  ;;  %v325_v18 = vpop.f32.mrb[2].mxu0  ;;  %v367_v19 = vpop.f32.mrb[2].mxu1 }
 0x185   :  { %v371_v20 = vrot.slane %v322_v13, 4  ;;  %v383_v21 = vrot.slane %v365_v14, 4  ;;  %v326_v22 = vadd.f32 %v325_v18, %v150_v10  ;;  %v368_v23 = vadd.f32 %v367_v19, %v152_v11  ;;  %v327_v24 = vpop.f32.mrb[3].mxu0  ;;  %v772_v25 = vpop.f32.mrb[3].mxu1 }
 0x186   :  { %v377_v26 = vrot.slane %v324_v17, 4  ;;  %v328_v0 = vadd.f32 %v327_v24, %v151_v51 }
 0x187   :  { %v372_v28 = vmax.f32 %v322_v13, %v371_v20  ;;  %v384_v29 = vmax.f32 %v365_v14, %v383_v21  ;;  %v389_v30 = vrot.slane %v326_v22, 4  ;;  %v401_v31 = vrot.slane %v368_v23, 4 }
 0x188   :  { %v378_v32 = vmax.f32 %v324_v17, %v377_v26  ;;  %v395_v33 = vrot.slane %v328_v0, 4  ;;  %v691_v26 = vld [vmem:[%s1129_s5] ss:$0 sm:$0xff] }
 0x189   :  { %v373_v34 = vrot.slane %v372_v28, 2  ;;  %v385_v35 = vrot.slane %v384_v29, 2  ;;  %v390_v36 = vmax.f32 %v326_v22, %v389_v30  ;;  %v402_v37 = vmax.f32 %v368_v23, %v401_v31 }
 0x18a   :  { %v379_v38 = vrot.slane %v378_v32, 2  ;;  %v396_v41 = vmax.f32 %v328_v0, %v395_v33 }
 0x18b   :  { %v374_v42 = vmax.f32 %v372_v28, %v373_v34  ;;  %v386_v43 = vmax.f32 %v384_v29, %v385_v35  ;;  %v391_v44 = vrot.slane %v390_v36, 2  ;;  %v403_v46 = vrot.slane %v402_v37, 2 }
 0x18c   :  { %v380_v47 = vmax.f32 %v378_v32, %v379_v38  ;;  %v397_v48 = vrot.slane %v396_v41, 2 }
 0x18d   :  { %v375_v50 = vrot.slane %v374_v42, 1  ;;  %v387_v52 = vrot.slane %v386_v43, 1  ;;  %v392_v53 = vmax.f32 %v390_v36, %v391_v44  ;;  %v404_v54 = vmax.f32 %v402_v37, %v403_v46 }
 0x18e   :  { %v381_v55 = vrot.slane %v380_v47, 1  ;;  %v398_v58 = vmax.f32 %v396_v41, %v397_v48 }
 0x18f   :  { %v376_v59 = vmax.f32 %v374_v42, %v375_v50  ;;  %v388_v60 = vmax.f32 %v386_v43, %v387_v52  ;;  %v393_v61 = vrot.slane %v392_v53, 1  ;;  %v405_v62 = vrot.slane %v404_v54, 1 }
 0x190   :  { %v382_v63 = vmax.f32 %v380_v47, %v381_v55  ;;  %v399_v2 = vrot.slane %v398_v58, 1 }
 0x191   :  { %v394_v5 = vmax.f32 %v392_v53, %v393_v61  ;;  %v406_v6 = vmax.f32 %v404_v54, %v405_v62  ;;  %v426_v10 = vadd.f32 %v420_v57, %v388_v60  ;;  %v424_v11 = vadd.f32 %v412_v56, %v376_v59 }
 0x192   :  { %v400_v7 = vmax.f32 %v398_v58, %v399_v2  ;;  %v425_v51 = vadd.f32 %v416_v4, %v382_v63 }
 0x193   :  { %v427_v8 = vadd.f32 %v412_v56, %v394_v5  ;;  %v429_v9 = vadd.f32 %v420_v57, %v406_v6  ;;  %v432_v14 = vmax.f32 %v426_v10, 0.0  ;;  %v430_v16 = vmax.f32 %v424_v11, 0.0 }
 0x194   :  { %v428_v1 = vadd.f32 %v416_v4, %v400_v7  ;;  %v431_v18 = vmax.f32 %v425_v51, 0.0 }
 0x195   :  { %v435_v12 = vmax.f32 %v429_v9, 0.0  ;;  %v433_v3 = vmax.f32 %v427_v8, 0.0 }
 0x196   :  { %v434_v13 = vmax.f32 %v428_v1, 0.0 }
 0x197   :  { %v502_v15 = vrot.slane %v435_v12, 7  ;;  %v497_v17 = vrot.slane %v433_v3, 7 }
 0x198   :  { %v500_v19 = vrot.slane %v434_v13, 7 }
 0x199   :  { %v503_v20 = vsel %vm498_vm4, %v502_v15, %v432_v14  ;;  %v499_v21 = vsel %vm498_vm4, %v497_v17, %v430_v16 }
 0x19a   :  { %806 = vmatmul.mubr.f32.vlgmr.msra.gmra.mrb[4].mxu1 %v503_v20  ;;  %v501_v22 = vsel %vm498_vm4, %v500_v19, %v431_v18 }
 0x19b   :  { %571 = vmatprep.mubr.f32.mxu0 %v501_v22 }
 0x19c   :  { %572 = vmatmul.mubr.f32.vlgmr.msra.gmra.mrb[4].mxu0 %v499_v21 }
 0x26d   :  { %v643_v23 = vpop.f32.mrb[4].mxu1 }
 0x26e   :  { %v807_v24 = vpop.f32.mrb[5].mxu1 }
 0x26f   :  { %v733_v25 = vpop.f32.mrb[4].mxu0 }
 0x270   :  { %v734_v27 = vpop.f32.mrb[5].mxu0 }
 0x271   :  { %v735_v0 = vadd.f32 %v734_v27, %v733_v25 }
 0x273   :  { %v574_v28 = vadd.f32 %v735_v0, %v691_v26 }
 0x275   :  { %v644_v29 = vadd.f32 %v643_v23, %v574_v28 }
 0x277   :  { %647 = vst [vmem:[#allocation7] sm:$0x3] %v644_v29 }
 0x278   :  { %967 = shalt.err (!%p964_p6)
}
 0x279   :  { %s968_s21 = scalar_lea.hbm %s1130_s6, 32 }
 0x27a   :  { %p969_p7 = scmp.ne.s32.totalorder %s1130_s6, %s968_s21  ;;  %p972_p8 = scmp.lt.u32.totalorder %s968_s21, %s1130_s6 }
 0x27c   :  { %p974_p9 = pnand %p972_p8, %p969_p7 }
 0x27e   :  { %977 = shalt.err (!%p974_p9)
}
 0x27f   :  { %657 = dma.vmem_to_hbm [thread:$0]  %s655_s18, 32, %s1130_s6, [#allocation4]  }
 0x280   :  { %982 = dma.done.wait [#allocation4], 32  }
 0x281   :  { %983 = vsyncadd [#allocation4], 4294967264 }
 0x282   :  { %661 = vsyncpa [#allocation3], 1 }
 0x283   :  { %662 = vsyncpa [#allocation6], 1 }
 0x284   :  { %663 = vsyncpa [#allocation4], 1 }

</bundles_post_ra>
